<compile_context>
chip_gen: v5e
topology: v5e:2x2
jax: 0.10.0
libtpu: 0.0.40
codegen_flags: <defaults>
</compile_context>

<pallas_src>
import jax
import jax.numpy as jnp
from jax.experimental import pallas as pl
from jax.experimental.pallas import tpu as pltpu

# ---- config (small shapes consistent with the module) ----
N = 2                      # batch
SEQ = 8                    # value_len = key_len = query_len
EMBED = 32                 # embed_size
HEADS = 4
HEAD_DIM = EMBED // HEADS  # 8
EXPANSION = 4
HIDDEN = EXPANSION * EMBED # 128
EMBED_PAD = 128            # lane-dense row width (== HIDDEN at these shapes)
EPS = 1e-5                 # nn.LayerNorm default eps

BH = N * HEADS             # fused batch*heads dim (HEAD-major: index = h*N + n)
ROWS = N * SEQ             # fused (batch, seq) rows
WO_ROWS = HEADS * HEAD_DIM # 32 rows of fc_out weight inside pslab


def transformer_block_kernel(
    qkv_ref,     # (3, BH, SEQ, HD)  [q, k^T, v] head-major (k is pre-transposed: (BH, HD, SEQ))
    bias_ref,    # (N, SEQ, SEQ)     additive mask bias (0 / -1e20), shared across heads
    qres_ref,    # (ROWS, EMBED_PAD) raw query for the residual, zero-padded lanes
    wsm_ref,     # (3, HD, HD)       [Wq*scale, Wk^T, Wv]
    pslab_ref,   # (40, EMBED_PAD)   rows 0..31: Wo (lane-padded); 32..39: bo,g1,be1,b1,b2,g2,be2,0
    wmats_ref,   # (2, EMBED_PAD, EMBED_PAD)  [W1 (rows padded), W2 (cols padded)]
    o_ref,       # (ROWS, EMBED_PAD)
):
    # ---- per-head projections (softmax 1/sqrt(EMBED) folded into Wq) ----
    q_hm = qkv_ref[0]                       # (BH, SEQ, HD)
    kT_hm = qkv_ref[1]                      # (BH, HD, SEQ)  pre-transposed in wrapper
    v_hm = qkv_ref[2]                       # (BH, SEQ, HD)
    wsm = wsm_ref[...]
    wq_s, wk_t, wv = wsm[0], wsm[1], wsm[2]

    qp = jnp.dot(q_hm.reshape(BH * SEQ, HEAD_DIM), wq_s,
                 preferred_element_type=jnp.float32).reshape(BH, SEQ, HEAD_DIM)
    vp = jnp.dot(v_hm.reshape(BH * SEQ, HEAD_DIM), wv,
                 preferred_element_type=jnp.float32).reshape(BH, SEQ, HEAD_DIM)
    # project K straight into its transposed layout (BH, HD, SEQ): no in-kernel transposes
    kTp = jnp.einsum("bed,bds->bes",
                     jnp.broadcast_to(wk_t[None], (BH, HEAD_DIM, HEAD_DIM)), kT_hm,
                     preferred_element_type=jnp.float32)

    # ---- attention (canonical batched matmuls) ----
    energy = jnp.einsum("bqd,bdk->bqk", qp, kTp,
                        preferred_element_type=jnp.float32)      # (BH, SEQ, SEQ)
    energy = energy.reshape(HEADS, N, SEQ, SEQ) + bias_ref[...][None]

    m = jnp.max(energy, axis=-1, keepdims=True)
    e = jnp.exp(energy - m)
    attn = e * pl.reciprocal(jnp.sum(e, axis=-1, keepdims=True), approx=True)

    ctx = jnp.einsum("bqk,bkd->bqd", attn.reshape(BH, SEQ, SEQ), vp,
                     preferred_element_type=jnp.float32)         # (BH, SEQ, HD)

    # ---- fc_out with the head reduction fused (Wo not tiled over batch) ----
    ps = pslab_ref[...]                                          # (40, EMBED_PAD)
    wo = ps[0:WO_ROWS].reshape(HEADS, HEAD_DIM, EMBED_PAD)
    bo = ps[WO_ROWS + 0:WO_ROWS + 1]
    g1 = ps[WO_ROWS + 1:WO_ROWS + 2]
    be1 = ps[WO_ROWS + 2:WO_ROWS + 3]
    b1 = ps[WO_ROWS + 3:WO_ROWS + 4]
    b2 = ps[WO_ROWS + 4:WO_ROWS + 5]
    g2 = ps[WO_ROWS + 5:WO_ROWS + 6]
    be2 = ps[WO_ROWS + 6:WO_ROWS + 7]

    ctx_h = ctx.reshape(HEADS, N * SEQ, HEAD_DIM)                # free leading reshape
    out_h = jnp.einsum("hrd,hde->hre", ctx_h, wo,
                       preferred_element_type=jnp.float32)       # (HEADS, ROWS, 128)
    attn_out = jnp.sum(out_h, axis=0) + bo                       # (ROWS, 128)

    def layernorm(x, g, b):
        # lanes EMBED..127 are zero by construction; stats over the true EMBED
        # columns via sums, E[x^2]-mu^2 keeps the zero pad lanes inert.
        mu = jnp.sum(x, axis=-1, keepdims=True) * (1.0 / EMBED)
        ex2 = jnp.sum(x * x, axis=-1, keepdims=True) * (1.0 / EMBED)
        return (x - mu) * jax.lax.rsqrt(ex2 - mu * mu + EPS) * g + b

    # residual + norm1 (dropout = identity)
    x = layernorm(attn_out + qres_ref[...], g1, be1)

    # feed-forward: Linear -> ReLU -> Linear (all lane-dense, width 128)
    h1 = jnp.maximum(
        jnp.dot(x, wmats_ref[0], preferred_element_type=jnp.float32) + b1, 0.0)
    ffn = jnp.dot(h1, wmats_ref[1], preferred_element_type=jnp.float32) + b2

    # residual + norm2 (dropout = identity); full-width unmasked store
    o_ref[...] = layernorm(ffn + x, g2, be2).astype(o_ref.dtype)


@jax.jit
def transformer_block(value, key, query, mask, p):
    """value/key/query: (N, SEQ, EMBED) f32, mask: (N, SEQ, SEQ) i32."""
    # head-major layouts (batch index = h*N + n); free XLA plumbing, not kernel work
    def to_heads(x):                                  # -> (BH, SEQ, HD)
        return (x.reshape(N, SEQ, HEADS, HEAD_DIM)
                 .transpose(2, 0, 1, 3).reshape(BH, SEQ, HEAD_DIM))

    def to_heads_t(x):                                # -> (BH, HD, SEQ)  (K pre-transposed)
        return (x.reshape(N, SEQ, HEADS, HEAD_DIM)
                 .transpose(2, 0, 3, 1).reshape(BH, HEAD_DIM, SEQ))

    # NOTE: stacking q / k^T / v relies on SEQ == HEAD_DIM at these shapes.
    qkv_hm = jnp.stack([to_heads(query), to_heads_t(key), to_heads(value)])

    # additive mask bias, one (SEQ,SEQ) slab per batch element (broadcast over heads in-kernel)
    bias = jnp.where(mask == 0, jnp.float32(-1e20), jnp.float32(0.0))

    # residual input, zero-padded to the lane-dense width
    qres_pad = jnp.pad(query.reshape(ROWS, EMBED), ((0, 0), (0, EMBED_PAD - EMBED)))

    _flops = 2 * (3 * BH * SEQ * HEAD_DIM * HEAD_DIM          # q/k/v projections
                  + 2 * BH * SEQ * SEQ * HEAD_DIM             # QK^T + PV
                  + HEADS * ROWS * HEAD_DIM * EMBED_PAD       # fc_out
                  + 2 * ROWS * EMBED_PAD * HIDDEN)            # FFN
    _transc = BH * SEQ * SEQ + BH * SEQ + 2 * ROWS
    _bytes = 4 * (qkv_hm.size + bias.size + qres_pad.size + p["w_small"].size
                  + p["pslab"].size + p["wmats"].size + ROWS * EMBED_PAD)

    vmem = pl.BlockSpec(memory_space=pltpu.MemorySpace.VMEM)
    out = pl.pallas_call(
        transformer_block_kernel,
        out_shape=jax.ShapeDtypeStruct((ROWS, EMBED_PAD), jnp.float32),
        in_specs=[vmem] * 6,
        out_specs=vmem,
        cost_estimate=pl.CostEstimate(flops=_flops, transcendentals=_transc,
                                      bytes_accessed=_bytes),
    )(qkv_hm, bias, qres_pad, p["w_small"], p["pslab"], p["wmats"])
    return out[:, :EMBED].reshape(N, SEQ, EMBED)


def make_params(rng):
    keys = jax.random.split(rng, 9)
    s = 0.02
    wq = jax.random.normal(keys[0], (HEAD_DIM, HEAD_DIM), jnp.float32) * s  # (in, out)
    wk = jax.random.normal(keys[1], (HEAD_DIM, HEAD_DIM), jnp.float32) * s
    wv = jax.random.normal(keys[2], (HEAD_DIM, HEAD_DIM), jnp.float32) * s
    wo = jax.random.normal(keys[3], (EMBED, EMBED), jnp.float32) * s        # (in, out)
    bo = jax.random.normal(keys[4], (1, EMBED), jnp.float32) * s
    w1 = jax.random.normal(keys[5], (EMBED, HIDDEN), jnp.float32) * s
    b1 = jax.random.normal(keys[6], (1, HIDDEN), jnp.float32) * s
    w2 = jax.random.normal(keys[7], (HIDDEN, EMBED), jnp.float32) * s
    b2 = jax.random.normal(keys[8], (1, EMBED), jnp.float32) * s
    g1 = jnp.ones((1, EMBED), jnp.float32)
    be1 = jnp.zeros((1, EMBED), jnp.float32)
    g2 = jnp.ones((1, EMBED), jnp.float32)
    be2 = jnp.zeros((1, EMBED), jnp.float32)

    # ---- packed / lane-dense operands for the kernel ----
    scale = 1.0 / jnp.sqrt(jnp.float32(EMBED))
    w_small = jnp.stack([wq * scale, wk.T, wv])                  # (3, HD, HD)

    def pad_cols(a):
        return jnp.pad(a, ((0, 0), (0, EMBED_PAD - a.shape[-1])))

    wo_pad = pad_cols(wo)                                        # (32, 128)
    vec_rows = jnp.concatenate(
        [pad_cols(bo), pad_cols(g1), pad_cols(be1), b1,          # b1 already 128 wide
         pad_cols(b2), pad_cols(g2), pad_cols(be2),
         jnp.zeros((1, EMBED_PAD), jnp.float32)], axis=0)        # (8, 128)
    pslab = jnp.concatenate([wo_pad, vec_rows], axis=0)          # (40, 128)

    w1_pad = jnp.pad(w1, ((0, EMBED_PAD - EMBED), (0, 0)))       # (128, 128), extra rows zero
    w2_pad = pad_cols(w2)                                        # (128, 128), extra cols zero
    wmats = jnp.stack([w1_pad, w2_pad])                          # (2, 128, 128)

    return dict(
        wq=wq, wk=wk, wv=wv, wo=wo, bo=bo,
        w1=w1, b1=b1, w2=w2, b2=b2,
        g1=g1, be1=be1, g2=g2, be2=be2,
        w_small=w_small, pslab=pslab, wmats=wmats,
    )


def reference(value, key, query, mask, p):
    """Pure-JAX replica of the PyTorch forward (eval mode)."""
    d = HEAD_DIM
    v = value.reshape(N, SEQ, HEADS, d) @ p["wv"]
    k = key.reshape(N, SEQ, HEADS, d) @ p["wk"]
    q = query.reshape(N, SEQ, HEADS, d) @ p["wq"]
    energy = jnp.einsum("nqhd,nkhd->nhqk", q, k)
    energy = jnp.where(mask[:, None, :, :] == 0, jnp.float32(-1e20), energy)
    attn = jax.nn.softmax(energy / jnp.sqrt(jnp.float32(EMBED)), axis=3)
    out = jnp.einsum("nhql,nlhd->nqhd", attn, v).reshape(N, SEQ, EMBED)
    out = out @ p["wo"] + p["bo"]

    def ln(x, g, b):
        mu = x.mean(-1, keepdims=True)
        var = ((x - mu) ** 2).mean(-1, keepdims=True)
        return (x - mu) / jnp.sqrt(var + EPS) * g + b

    x = ln(out + query, p["g1"], p["be1"])
    ffn = jnp.maximum(x @ p["w1"] + p["b1"], 0.0) @ p["w2"] + p["b2"]
    return ln(ffn + x, p["g2"], p["be2"])


if __name__ == "__main__":
    root = jax.random.PRNGKey(0)
    k_val, k_key, k_qry, k_par = jax.random.split(root, 4)

    value = jax.random.normal(k_val, (N, SEQ, EMBED), jnp.float32)
    key = jax.random.normal(k_key, (N, SEQ, EMBED), jnp.float32)
    query = jax.random.normal(k_qry, (N, SEQ, EMBED), jnp.float32)
    # causal mask, shared across heads: (N, q_len, k_len)
    mask = jnp.broadcast_to(
        jnp.tril(jnp.ones((SEQ, SEQ), jnp.int32)), (N, SEQ, SEQ)
    )

    params = make_params(k_par)

    out = jax.block_until_ready(transformer_block(value, key, query, mask, params))
    ref = jax.block_until_ready(reference(value, key, query, mask, params))

    assert out.shape == (N, SEQ, EMBED)
    max_diff = jnp.max(jnp.abs(out - ref))
    assert jnp.allclose(out, ref, atol=1e-3, rtol=1e-3), f"max abs diff {max_diff}"
    print("KERNEL_OK")
</pallas_src>

<mosaic_0001>
module attributes {stable_mosaic.version = 11 : i64} {
  func.func @transformer_block_kernel(%arg0: memref<3x8x8x8xf32, #tpu.memory_space<vmem>>, %arg1: memref<2x8x8xf32, #tpu.memory_space<vmem>>, %arg2: memref<16x128xf32, #tpu.memory_space<vmem>>, %arg3: memref<3x8x8xf32, #tpu.memory_space<vmem>>, %arg4: memref<40x128xf32, #tpu.memory_space<vmem>>, %arg5: memref<2x128x128xf32, #tpu.memory_space<vmem>>, %arg6: memref<16x128xf32, #tpu.memory_space<vmem>>) attributes {dimension_semantics = [], scalar_prefetch = 0 : i64, scratch_operands = 0 : i64, tpu.core_type = #tpu.core_type<tc>} {
    %c0 = arith.constant 0 : index
    %c0_0 = arith.constant 0 : index
    %c0_1 = arith.constant 0 : index
    %c0_2 = arith.constant 0 : index
    %0 = vector.load %arg0[%c0, %c0_0, %c0_1, %c0_2] : memref<3x8x8x8xf32, #tpu.memory_space<vmem>>, vector<1x8x8x8xf32>
    %1 = vector.shape_cast %0 : vector<1x8x8x8xf32> to vector<8x8x8xf32>
    %c1 = arith.constant 1 : index
    %c0_3 = arith.constant 0 : index
    %c0_4 = arith.constant 0 : index
    %c0_5 = arith.constant 0 : index
    %2 = vector.load %arg0[%c1, %c0_3, %c0_4, %c0_5] : memref<3x8x8x8xf32, #tpu.memory_space<vmem>>, vector<1x8x8x8xf32>
    %3 = vector.shape_cast %2 : vector<1x8x8x8xf32> to vector<8x8x8xf32>
    %c2 = arith.constant 2 : index
    %c0_6 = arith.constant 0 : index
    %c0_7 = arith.constant 0 : index
    %c0_8 = arith.constant 0 : index
    %4 = vector.load %arg0[%c2, %c0_6, %c0_7, %c0_8] : memref<3x8x8x8xf32, #tpu.memory_space<vmem>>, vector<1x8x8x8xf32>
    %5 = vector.shape_cast %4 : vector<1x8x8x8xf32> to vector<8x8x8xf32>
    %c0_9 = arith.constant 0 : index
    %c0_10 = arith.constant 0 : index
    %c0_11 = arith.constant 0 : index
    %6 = vector.load %arg3[%c0_9, %c0_10, %c0_11] : memref<3x8x8xf32, #tpu.memory_space<vmem>>, vector<3x8x8xf32>
    %7 = vector.extract_strided_slice %6 {offsets = [0, 0, 0], sizes = [1, 8, 8], strides = [1, 1, 1]} : vector<3x8x8xf32> to vector<1x8x8xf32>
    %8 = vector.shape_cast %7 : vector<1x8x8xf32> to vector<8x8xf32>
    %9 = vector.extract_strided_slice %6 {offsets = [1, 0, 0], sizes = [1, 8, 8], strides = [1, 1, 1]} : vector<3x8x8xf32> to vector<1x8x8xf32>
    %10 = vector.shape_cast %9 : vector<1x8x8xf32> to vector<8x8xf32>
    %11 = vector.extract_strided_slice %6 {offsets = [2, 0, 0], sizes = [1, 8, 8], strides = [1, 1, 1]} : vector<3x8x8xf32> to vector<1x8x8xf32>
    %12 = vector.shape_cast %11 : vector<1x8x8xf32> to vector<8x8xf32>
    %13 = vector.shape_cast %1 : vector<8x8x8xf32> to vector<64x8xf32>
    %cst = arith.constant dense<0.000000e+00> : vector<64x8xf32>
    %14 = tpu.matmul %13, %8, %cst {dimension_numbers = #tpu.dot_dimension_numbers<[1], [0], [0], [1], [0, 0, 1, 1], [], []>} : vector<64x8xf32>, vector<8x8xf32>, vector<64x8xf32> -> vector<64x8xf32>
    %15 = vector.shape_cast %14 : vector<64x8xf32> to vector<8x8x8xf32>
    %16 = vector.shape_cast %5 : vector<8x8x8xf32> to vector<64x8xf32>
    %cst_12 = arith.constant dense<0.000000e+00> : vector<64x8xf32>
    %17 = tpu.matmul %16, %12, %cst_12 {dimension_numbers = #tpu.dot_dimension_numbers<[1], [0], [0], [1], [0, 0, 1, 1], [], []>} : vector<64x8xf32>, vector<8x8xf32>, vector<64x8xf32> -> vector<64x8xf32>
    %18 = vector.shape_cast %17 : vector<64x8xf32> to vector<8x8x8xf32>
    %19 = vector.shape_cast %10 : vector<8x8xf32> to vector<1x8x8xf32>
    %20 = vector.shape_cast %19 : vector<1x8x8xf32> to vector<1x8x8xf32>
    %21 = vector.broadcast %20 : vector<1x8x8xf32> to vector<8x8x8xf32>
    "tpu.trace_start"() <{level = 10 : i32, message = "bed,bds->bes"}> : () -> ()
    %cst_13 = arith.constant dense<0.000000e+00> : vector<8x8x8xf32>
    %22 = tpu.matmul %21, %3, %cst_13 {dimension_numbers = #tpu.dot_dimension_numbers<[2], [1], [1], [2], [0, 0, 0, 1, 1, 2], [0], [0]>} : vector<8x8x8xf32>, vector<8x8x8xf32>, vector<8x8x8xf32> -> vector<8x8x8xf32>
    "tpu.trace_stop"() : () -> ()
    "tpu.trace_start"() <{level = 10 : i32, message = "bqd,bdk->bqk"}> : () -> ()
    %cst_14 = arith.constant dense<0.000000e+00> : vector<8x8x8xf32>
    %23 = tpu.matmul %15, %22, %cst_14 {dimension_numbers = #tpu.dot_dimension_numbers<[2], [1], [1], [2], [0, 0, 0, 1, 1, 2], [0], [0]>} : vector<8x8x8xf32>, vector<8x8x8xf32>, vector<8x8x8xf32> -> vector<8x8x8xf32>
    "tpu.trace_stop"() : () -> ()
    %24 = vector.shape_cast %23 : vector<8x8x8xf32> to vector<4x2x8x8xf32>
    %c0_15 = arith.constant 0 : index
    %c0_16 = arith.constant 0 : index
    %c0_17 = arith.constant 0 : index
    %25 = vector.load %arg1[%c0_15, %c0_16, %c0_17] : memref<2x8x8xf32, #tpu.memory_space<vmem>>, vector<2x8x8xf32>
    %26 = vector.shape_cast %25 : vector<2x8x8xf32> to vector<1x2x8x8xf32>
    %27 = vector.broadcast %26 : vector<1x2x8x8xf32> to vector<4x2x8x8xf32>
    %28 = arith.addf %24, %27 : vector<4x2x8x8xf32>
    %cst_18 = arith.constant dense<0xFF800000> : vector<4x2x8xf32>
    %29 = vector.multi_reduction <maximumf>, %28, %cst_18 [3] : vector<4x2x8x8xf32> to vector<4x2x8xf32>
    %30 = vector.shape_cast %29 : vector<4x2x8xf32> to vector<4x2x8x1xf32>
    %31 = vector.broadcast %30 : vector<4x2x8x1xf32> to vector<4x2x8x8xf32>
    %32 = arith.subf %28, %31 : vector<4x2x8x8xf32>
    %33 = math.exp %32 : vector<4x2x8x8xf32>
    %cst_19 = arith.constant dense<0.000000e+00> : vector<4x2x8xf32>
    %34 = vector.multi_reduction <add>, %33, %cst_19 [3] : vector<4x2x8x8xf32> to vector<4x2x8xf32>
    %35 = vector.shape_cast %34 : vector<4x2x8xf32> to vector<4x2x8x1xf32>
    %36 = tpu.reciprocal %35 {approx = true} : vector<4x2x8x1xf32> -> vector<4x2x8x1xf32>
    %37 = vector.broadcast %36 : vector<4x2x8x1xf32> to vector<4x2x8x8xf32>
    %38 = arith.mulf %33, %37 : vector<4x2x8x8xf32>
    %39 = vector.shape_cast %38 : vector<4x2x8x8xf32> to vector<8x8x8xf32>
    "tpu.trace_start"() <{level = 10 : i32, message = "bqk,bkd->bqd"}> : () -> ()
    %cst_20 = arith.constant dense<0.000000e+00> : vector<8x8x8xf32>
    %40 = tpu.matmul %39, %18, %cst_20 {dimension_numbers = #tpu.dot_dimension_numbers<[2], [1], [1], [2], [0, 0, 0, 1, 1, 2], [0], [0]>} : vector<8x8x8xf32>, vector<8x8x8xf32>, vector<8x8x8xf32> -> vector<8x8x8xf32>
    "tpu.trace_stop"() : () -> ()
    %c0_21 = arith.constant 0 : index
    %c0_22 = arith.constant 0 : index
    %41 = vector.load %arg4[%c0_21, %c0_22] : memref<40x128xf32, #tpu.memory_space<vmem>>, vector<40x128xf32>
    %42 = vector.extract_strided_slice %41 {offsets = [0, 0], sizes = [32, 128], strides = [1, 1]} : vector<40x128xf32> to vector<32x128xf32>
    %43 = vector.shape_cast %42 : vector<32x128xf32> to vector<4x8x128xf32>
    %44 = vector.extract_strided_slice %41 {offsets = [32, 0], sizes = [1, 128], strides = [1, 1]} : vector<40x128xf32> to vector<1x128xf32>
    %45 = vector.extract_strided_slice %41 {offsets = [33, 0], sizes = [1, 128], strides = [1, 1]} : vector<40x128xf32> to vector<1x128xf32>
    %46 = vector.extract_strided_slice %41 {offsets = [34, 0], sizes = [1, 128], strides = [1, 1]} : vector<40x128xf32> to vector<1x128xf32>
    %47 = vector.extract_strided_slice %41 {offsets = [35, 0], sizes = [1, 128], strides = [1, 1]} : vector<40x128xf32> to vector<1x128xf32>
    %48 = vector.extract_strided_slice %41 {offsets = [36, 0], sizes = [1, 128], strides = [1, 1]} : vector<40x128xf32> to vector<1x128xf32>
    %49 = vector.extract_strided_slice %41 {offsets = [37, 0], sizes = [1, 128], strides = [1, 1]} : vector<40x128xf32> to vector<1x128xf32>
    %50 = vector.extract_strided_slice %41 {offsets = [38, 0], sizes = [1, 128], strides = [1, 1]} : vector<40x128xf32> to vector<1x128xf32>
    %51 = vector.shape_cast %40 : vector<8x8x8xf32> to vector<4x16x8xf32>
    "tpu.trace_start"() <{level = 10 : i32, message = "hrd,hde->hre"}> : () -> ()
    %cst_23 = arith.constant dense<0.000000e+00> : vector<4x16x128xf32>
    %52 = tpu.matmul %51, %43, %cst_23 {dimension_numbers = #tpu.dot_dimension_numbers<[2], [1], [1], [2], [0, 0, 0, 1, 1, 2], [0], [0]>} : vector<4x16x8xf32>, vector<4x8x128xf32>, vector<4x16x128xf32> -> vector<4x16x128xf32>
    "tpu.trace_stop"() : () -> ()
    %cst_24 = arith.constant dense<0.000000e+00> : vector<16x128xf32>
    %53 = vector.multi_reduction <add>, %52, %cst_24 [0] : vector<4x16x128xf32> to vector<16x128xf32>
    %54 = vector.broadcast %44 : vector<1x128xf32> to vector<16x128xf32>
    %55 = arith.addf %53, %54 : vector<16x128xf32>
    %c0_25 = arith.constant 0 : index
    %c0_26 = arith.constant 0 : index
    %56 = vector.load %arg2[%c0_25, %c0_26] : memref<16x128xf32, #tpu.memory_space<vmem>>, vector<16x128xf32>
    %57 = arith.addf %55, %56 : vector<16x128xf32>
    %cst_27 = arith.constant dense<0.000000e+00> : vector<16xf32>
    %58 = vector.multi_reduction <add>, %57, %cst_27 [1] : vector<16x128xf32> to vector<16xf32>
    %59 = vector.shape_cast %58 : vector<16xf32> to vector<16x1xf32>
    %cst_28 = arith.constant 3.125000e-02 : f32
    %60 = vector.broadcast %cst_28 : f32 to vector<16x1xf32>
    %61 = arith.mulf %59, %60 : vector<16x1xf32>
    %62 = arith.mulf %57, %57 : vector<16x128xf32>
    %cst_29 = arith.constant dense<0.000000e+00> : vector<16xf32>
    %63 = vector.multi_reduction <add>, %62, %cst_29 [1] : vector<16x128xf32> to vector<16xf32>
    %64 = vector.shape_cast %63 : vector<16xf32> to vector<16x1xf32>
    %cst_30 = arith.constant 3.125000e-02 : f32
    %65 = vector.broadcast %cst_30 : f32 to vector<16x1xf32>
    %66 = arith.mulf %64, %65 : vector<16x1xf32>
    %67 = vector.broadcast %61 : vector<16x1xf32> to vector<16x128xf32>
    %68 = arith.subf %57, %67 : vector<16x128xf32>
    %69 = arith.mulf %61, %61 : vector<16x1xf32>
    %70 = arith.subf %66, %69 : vector<16x1xf32>
    %cst_31 = arith.constant 9.99999974E-6 : f32
    %71 = vector.broadcast %cst_31 : f32 to vector<16x1xf32>
    %72 = arith.addf %70, %71 : vector<16x1xf32>
    %73 = math.rsqrt %72 : vector<16x1xf32>
    %74 = vector.broadcast %73 : vector<16x1xf32> to vector<16x128xf32>
    %75 = arith.mulf %68, %74 : vector<16x128xf32>
    %76 = vector.broadcast %45 : vector<1x128xf32> to vector<16x128xf32>
    %77 = arith.mulf %75, %76 : vector<16x128xf32>
    %78 = vector.broadcast %46 : vector<1x128xf32> to vector<16x128xf32>
    %79 = arith.addf %77, %78 : vector<16x128xf32>
    %c0_32 = arith.constant 0 : index
    %c0_33 = arith.constant 0 : index
    %c0_34 = arith.constant 0 : index
    %80 = vector.load %arg5[%c0_32, %c0_33, %c0_34] : memref<2x128x128xf32, #tpu.memory_space<vmem>>, vector<1x128x128xf32>
    %81 = vector.shape_cast %80 : vector<1x128x128xf32> to vector<128x128xf32>
    %cst_35 = arith.constant dense<0.000000e+00> : vector<16x128xf32>
    %82 = tpu.matmul %79, %81, %cst_35 {dimension_numbers = #tpu.dot_dimension_numbers<[1], [0], [0], [1], [0, 0, 1, 1], [], []>} : vector<16x128xf32>, vector<128x128xf32>, vector<16x128xf32> -> vector<16x128xf32>
    %83 = vector.broadcast %47 : vector<1x128xf32> to vector<16x128xf32>
    %84 = arith.addf %82, %83 : vector<16x128xf32>
    %cst_36 = arith.constant 0.000000e+00 : f32
    %85 = vector.broadcast %cst_36 : f32 to vector<16x128xf32>
    %86 = arith.maximumf %84, %85 : vector<16x128xf32>
    %c1_37 = arith.constant 1 : index
    %c0_38 = arith.constant 0 : index
    %c0_39 = arith.constant 0 : index
    %87 = vector.load %arg5[%c1_37, %c0_38, %c0_39] : memref<2x128x128xf32, #tpu.memory_space<vmem>>, vector<1x128x128xf32>
    %88 = vector.shape_cast %87 : vector<1x128x128xf32> to vector<128x128xf32>
    %cst_40 = arith.constant dense<0.000000e+00> : vector<16x128xf32>
    %89 = tpu.matmul %86, %88, %cst_40 {dimension_numbers = #tpu.dot_dimension_numbers<[1], [0], [0], [1], [0, 0, 1, 1], [], []>} : vector<16x128xf32>, vector<128x128xf32>, vector<16x128xf32> -> vector<16x128xf32>
    %90 = vector.broadcast %48 : vector<1x128xf32> to vector<16x128xf32>
    %91 = arith.addf %89, %90 : vector<16x128xf32>
    %92 = arith.addf %91, %79 : vector<16x128xf32>
    %cst_41 = arith.constant dense<0.000000e+00> : vector<16xf32>
    %93 = vector.multi_reduction <add>, %92, %cst_41 [1] : vector<16x128xf32> to vector<16xf32>
    %94 = vector.shape_cast %93 : vector<16xf32> to vector<16x1xf32>
    %cst_42 = arith.constant 3.125000e-02 : f32
    %95 = vector.broadcast %cst_42 : f32 to vector<16x1xf32>
    %96 = arith.mulf %94, %95 : vector<16x1xf32>
    %97 = arith.mulf %92, %92 : vector<16x128xf32>
    %cst_43 = arith.constant dense<0.000000e+00> : vector<16xf32>
    %98 = vector.multi_reduction <add>, %97, %cst_43 [1] : vector<16x128xf32> to vector<16xf32>
    %99 = vector.shape_cast %98 : vector<16xf32> to vector<16x1xf32>
    %cst_44 = arith.constant 3.125000e-02 : f32
    %100 = vector.broadcast %cst_44 : f32 to vector<16x1xf32>
    %101 = arith.mulf %99, %100 : vector<16x1xf32>
    %102 = vector.broadcast %96 : vector<16x1xf32> to vector<16x128xf32>
    %103 = arith.subf %92, %102 : vector<16x128xf32>
    %104 = arith.mulf %96, %96 : vector<16x1xf32>
    %105 = arith.subf %101, %104 : vector<16x1xf32>
    %cst_45 = arith.constant 9.99999974E-6 : f32
    %106 = vector.broadcast %cst_45 : f32 to vector<16x1xf32>
    %107 = arith.addf %105, %106 : vector<16x1xf32>
    %108 = math.rsqrt %107 : vector<16x1xf32>
    %109 = vector.broadcast %108 : vector<16x1xf32> to vector<16x128xf32>
    %110 = arith.mulf %103, %109 : vector<16x128xf32>
    %111 = vector.broadcast %49 : vector<1x128xf32> to vector<16x128xf32>
    %112 = arith.mulf %110, %111 : vector<16x128xf32>
    %113 = vector.broadcast %50 : vector<1x128xf32> to vector<16x128xf32>
    %114 = arith.addf %112, %113 : vector<16x128xf32>
    %c0_46 = arith.constant 0 : index
    %c0_47 = arith.constant 0 : index
    %115 = vector.load %arg6[%c0_46, %c0_47] : memref<16x128xf32, #tpu.memory_space<vmem>>, vector<16x128xf32>
    tpu.vector_store %arg6[%c0_46, %c0_47], %114 {strides = array<i32>} : memref<16x128xf32, #tpu.memory_space<vmem>>, vector<16x128xf32>,
    return
  }
}

</mosaic_0001>

<bundles_post_ra>
// kernel: transformer_block.1
= control target key start
LH: loop header
LB: loop body
LE: loop exit
PB: predicated region body
PF: predicated region fallthrough
CT: control target
= control target key end

     0   :  { %vm52_vm0 = vcmask 64512   ;;  %s1589_s3 = inlined_call_operand.vmem [shape: f32[3,8,8], index: 3, kind: input, shape index: {}]   ;;  %s1590_s0 = inlined_call_operand.vmem [shape: f32[3,8,8,8], index: 0, kind: input, shape index: {}]   ;;  %s1591_s1 = inlined_call_operand.vmem [shape: f32[2,8,8], index: 1, kind: input, shape index: {}]   ;;  %s1592_s4 = inlined_call_operand.vmem [shape: f32[40,128], index: 4, kind: input, shape index: {}]   ;;  %s1593_s2 = inlined_call_operand.vmem [shape: f32[16,128], index: 2, kind: input, shape index: {}]   ;;  %s1594_s5 = inlined_call_operand.vmem [shape: f32[2,128,128], index: 5, kind: input, shape index: {}]   ;;  %s1595_s6 = inlined_call_operand.vmem [shape: f32[16,128], index: 6, kind: output, shape index: {}]  }
   0x1   :  { %v49_v0 = vld [vmem:[%s1589_s3] sm:$0xff]  ;;  %v51_v1 = vld [vmem:[%s1589_s3 + $0x10] sm:$0xff]  ;;  %v1138_v6 = vld [vmem:[%s1590_s0 + $0x48] sm:$0xff] }
   0x2   :  { %92 = vmatpush.msra.mxu0 %v49_v0  ;;  %1217 = vmatpush.msra.mxu2 %v49_v0  ;;  %v23_v2 = vld [vmem:[%s1590_s0] sm:$0xff]  ;;  %v29_v3 = vld [vmem:[%s1590_s0 + $0x30] sm:$0xff]  ;;  %v1140_v9 = vld [vmem:[%s1590_s0 + $0x58] sm:$0xff] }
   0x3   :  { %v1151_v4 = vld [vmem:[%s1590_s0 + $0xb0] sm:$0xff]  ;;  %1218 = vmatpush.msra.mxu3 %v51_v1  ;;  %1153 = vmatmul.msk.f32.vlgmr.msra.gmra.mxu0 %vm52_vm0, %v23_v2  ;;  %v1137_v5 = vld [vmem:[%s1590_s0 + $0x40] sm:$0xff]  ;;  %v24_v10 = vld [vmem:[%s1590_s0 + $0x8] sm:$0xff] }
   0x4   :  { %1159 = vmatmul.msk.f32.vlgmr.msra.gmra.mxu2 %vm52_vm0, %v29_v3  ;;  %1167 = vmatmul.msk.f32.vlgmr.msra.gmra.mxu3 %vm52_vm0, %v1151_v4  ;;  %v1145_v7 = vld [vmem:[%s1590_s0 + $0x80] sm:$0xff]  ;;  %v1139_v8 = vld [vmem:[%s1590_s0 + $0x50] sm:$0xff]  ;;  %v30_v11 = vld [vmem:[%s1590_s0 + $0x38] sm:$0xff] }
   0x5   :  { %201 = vmatpush.msrb.mxu2 %v1137_v5  ;;  %221 = vmatpush.msrb.mxu3 %v1138_v6  ;;  %v1152_v12 = vld [vmem:[%s1590_s0 + $0xb8] sm:$0xff]  ;;  %v1146_v13 = vld [vmem:[%s1590_s0 + $0x88] sm:$0xff]  ;;  %v25_v14 = vld [vmem:[%s1590_s0 + $0x10] sm:$0xff] }
   0x6   :  { %157 = vmatpush.msra.mxu1 %v51_v1  ;;  %v50_v15 = vld [vmem:[%s1589_s3 + $0x8] sm:$0xff]  ;;  %v1141_v16 = vld [vmem:[%s1590_s0 + $0x60] sm:$0xff]  ;;  %v1147_v18 = vld [vmem:[%s1590_s0 + $0x90] sm:$0xff] }
   0x7   :  { %241 = vmatpush.msra.mxu2 %v1139_v8  ;;  %1161 = vmatmul.msk.f32.vlgmr.msra.gmra.mxu1 %vm52_vm0, %v1145_v7  ;;  %v1142_v17 = vld [vmem:[%s1590_s0 + $0x68] sm:$0xff]  ;;  %v26_v19 = vld [vmem:[%s1590_s0 + $0x18] sm:$0xff]  ;;  %v1143_v20 = vld [vmem:[%s1590_s0 + $0x70] sm:$0xff] }
   0x8   :  { %261 = vmatpush.msra.mxu3 %v1140_v9  ;;  %v1144_v21 = vld [vmem:[%s1590_s0 + $0x78] sm:$0xff]  ;;  %v27_v23 = vld [vmem:[%s1590_s0 + $0x20] sm:$0xff]  ;;  %v28_v24 = vld [vmem:[%s1590_s0 + $0x28] sm:$0xff] }
   0x9   :  { %v1148_v22 = vld [vmem:[%s1590_s0 + $0x98] sm:$0xff]  ;;  %v531_v47 = vld [vmem:[%s1591_s1 + $0x8] sm:$0xff]  ;;  %v530_v52 = vld [vmem:[%s1591_s1] sm:$0xff] }
   0xa   :  { %v1149_v9 = vld [vmem:[%s1590_s0 + $0xa0] sm:$0xff] }
   0xb   :  { %1154 = vmatmul.msk.f32.gmra.mxu0 %vm52_vm0, %v24_v10 }
   0xc   :  { %1160 = vmatmul.msk.f32.gmra.mxu2 %vm52_vm0, %v30_v11  ;;  %1168 = vmatmul.msk.f32.gmra.mxu3 %vm52_vm0, %v1152_v12 }
   0xf   :  { %1162 = vmatmul.msk.f32.gmra.mxu1 %vm52_vm0, %v1146_v13 }
  0x13   :  { %1155 = vmatmul.msk.f32.gmra.mxu0 %vm52_vm0, %v25_v14 }
  0x14   :  { %1169 = vmatmul.msk.f32.vlgmr.msrb.gmra.mxu2 %vm52_vm0, %v50_v15  ;;  %1170 = vmatmul.msk.f32.vlgmr.msrb.gmra.mxu3 %vm52_vm0, %v50_v15 }
  0x15   :  { %281 = vmatpush.msrb.mxu2 %v1141_v16  ;;  %301 = vmatpush.msrb.mxu3 %v1142_v17 }
  0x17   :  { %1163 = vmatmul.msk.f32.gmra.mxu1 %vm52_vm0, %v1147_v18 }
  0x1b   :  { %1156 = vmatmul.msk.f32.gmra.mxu0 %vm52_vm0, %v26_v19 }
  0x1c   :  { %1171 = vmatmul.msk.f32.vlgmr.msra.gmra.mxu2 %vm52_vm0, %v50_v15  ;;  %1172 = vmatmul.msk.f32.vlgmr.msra.gmra.mxu3 %vm52_vm0, %v50_v15 }
  0x1d   :  { %321 = vmatpush.msra.mxu2 %v1143_v20  ;;  %341 = vmatpush.msra.mxu3 %v1144_v21 }
  0x1f   :  { %1164 = vmatmul.msk.f32.gmra.mxu1 %vm52_vm0, %v1148_v22 }
  0x23   :  { %1157 = vmatmul.msk.f32.gmra.mxu0 %vm52_vm0, %v27_v23 }
  0x24   :  { %1173 = vmatmul.msk.f32.vlgmr.msrb.gmra.mxu2 %vm52_vm0, %v50_v15  ;;  %1174 = vmatmul.msk.f32.vlgmr.msrb.gmra.mxu3 %vm52_vm0, %v50_v15 }
  0x27   :  { %1165 = vmatmul.msk.f32.gmra.mxu1 %vm52_vm0, %v1149_v9 }
  0x2b   :  { %1158 = vmatmul.msk.f32.gmra.mxu0 %vm52_vm0, %v28_v24 }
  0x2c   :  { %1175 = vmatmul.msk.f32.vlgmr.msra.gmra.mxu2 %vm52_vm0, %v50_v15  ;;  %1176 = vmatmul.msk.f32.vlgmr.msra.gmra.mxu3 %vm52_vm0, %v50_v15  ;;  %v1150_v15 = vld [vmem:[%s1590_s0 + $0xa8] sm:$0xff] }
  0x2f   :  { %1166 = vmatmul.msk.f32.gmra.mxu1 %vm52_vm0, %v1150_v15  ;;  %v814_v15 = vld [vmem:[%s1592_s4 + $0x10] sm:$0xff] }
  0x80   :  { %v94_v25 = vpop.f32.mrf.mxu0 }
  0x84   :  { %v159_v26 = vpop.f32.mrf.mxu1 }
  0x85   :  { %646 = vmatpush.msrb.mxu0 %v159_v26 }
  0x87   :  { %v112_v27 = vpop.f32.mrf.mxu2  ;;  %v177_v28 = vpop.f32.mrf.mxu3 }
  0x88   :  { %v97_v29 = vpop.f32.mrf.mxu0 }
  0x8c   :  { %v162_v30 = vpop.f32.mrf.mxu1 }
  0x8d   :  { %669 = vmatpush.msrb.mxu1 %v162_v30 }
  0x8f   :  { %v115_v31 = vpop.f32.mrf.mxu2  ;;  %v180_v32 = vpop.f32.mrf.mxu3 }
  0x90   :  { %v100_v33 = vpop.f32.mrf.mxu0 }
  0x94   :  { %v165_v40 = vpop.f32.mrf.mxu1 }
  0x97   :  { %v203_v34 = vpop.f32.mrf.mxu2  ;;  %v223_v35 = vpop.f32.mrf.mxu3 }
  0x98   :  { %364 = vmatpush.msrb.mxu2 %v203_v34  ;;  %387 = vmatpush.msrb.mxu3 %v223_v35  ;;  %v103_v36 = vpop.f32.mrf.mxu0 }
  0x99   :  { %1177 = vmatmul.msk.f32.vlgmr.msrb.gmra.mxu2 %vm52_vm0, %v94_v25  ;;  %1178 = vmatmul.msk.f32.vlgmr.msrb.gmra.mxu3 %vm52_vm0, %v97_v29 }
  0x9c   :  { %v168_v44 = vpop.f32.mrf.mxu1 }
  0x9f   :  { %v243_v37 = vpop.f32.mrf.mxu2  ;;  %v263_v38 = vpop.f32.mrf.mxu3 }
  0xa0   :  { %410 = vmatpush.msra.mxu2 %v243_v37  ;;  %433 = vmatpush.msra.mxu3 %v263_v38  ;;  %v106_v39 = vpop.f32.mrf.mxu0 }
  0xa1   :  { %1179 = vmatmul.msk.f32.vlgmr.msra.gmra.mxu2 %vm52_vm0, %v100_v33  ;;  %1180 = vmatmul.msk.f32.vlgmr.msra.gmra.mxu3 %vm52_vm0, %v103_v36 }
  0xa7   :  { %v283_v41 = vpop.f32.mrf.mxu2  ;;  %v303_v42 = vpop.f32.mrf.mxu3 }
  0xa8   :  { %456 = vmatpush.msrb.mxu2 %v283_v41  ;;  %v109_v43 = vpop.f32.mrf.mxu0  ;;  %479 = vmatpush.msrb.mxu3 %v303_v42 }
  0xa9   :  { %1181 = vmatmul.msk.f32.vlgmr.msrb.gmra.mxu2 %vm52_vm0, %v106_v39  ;;  %1182 = vmatmul.msk.f32.vlgmr.msrb.gmra.mxu3 %vm52_vm0, %v109_v43 }
  0xaf   :  { %v323_v45 = vpop.f32.mrf.mxu2  ;;  %v343_v46 = vpop.f32.mrf.mxu3 }
  0xb0   :  { %502 = vmatpush.msra.mxu2 %v323_v45  ;;  %525 = vmatpush.msra.mxu3 %v343_v46 }
  0xb1   :  { %1183 = vmatmul.msk.f32.vlgmr.msra.gmra.mxu2 %vm52_vm0, %v112_v27  ;;  %1184 = vmatmul.msk.f32.vlgmr.msra.gmra.mxu3 %vm52_vm0, %v115_v31 }
  0xb2   :  { %715 = vmatpush.msrb.mxu3 %v168_v44  ;;  %692 = vmatpush.msrb.mxu2 %v165_v40 }
  0xb4   :  { %784 = vmatpush.msra.mxu2 %v177_v28  ;;  %807 = vmatpush.msra.mxu3 %v180_v32 }
 0x11c   :  { %v366_v48 = vpop.f32.mrf.mxu2  ;;  %v389_v49 = vpop.f32.mrf.mxu3 }
 0x11d   :  { %v533_v50 = vadd.f32 %v531_v47, %v389_v49  ;;  %v532_v59 = vadd.f32 %v530_v52, %v366_v48 }
 0x11f   :  { %v543_v51 = vsel %vm52_vm0, %v533_v50, -inf  ;;  %v540_v63 = vsel %vm52_vm0, %v532_v59, -inf }
 0x120   :  { %544 = vmax.xlane.f32.xlu2 %v543_v51  ;;  %v171_v51 = vpop.f32.mrf.mxu1 }
 0x121   :  { %738 = vmatpush.msra.mxu0 %v171_v51  ;;  %v1009_v51 = vld [vmem:[%s1594_s5 + $0x68] sm:$0xff] }
 0x124   :  { %v412_v53 = vpop.f32.mrf.mxu2  ;;  %v435_v54 = vpop.f32.mrf.mxu3 }
 0x125   :  { %v534_v55 = vadd.f32 %v530_v52, %v412_v53  ;;  %v535_v56 = vadd.f32 %v531_v47, %v435_v54 }
 0x127   :  { %v546_v57 = vsel %vm52_vm0, %v534_v55, -inf  ;;  %v549_v58 = vsel %vm52_vm0, %v535_v56, -inf }
 0x128   :  { %547 = vmax.xlane.f32.xlu0 %v546_v57  ;;  %550 = vmax.xlane.f32.xlu1 %v549_v58  ;;  %v174_v54 = vpop.f32.mrf.mxu1 }
 0x129   :  { %761 = vmatpush.msra.mxu1 %v174_v54  ;;  %v1006_v54 = vld [vmem:[%s1594_s5 + $0x50] sm:$0xff] }
 0x12c   :  { %v458_v60 = vpop.f32.mrf.mxu2  ;;  %v481_v61 = vpop.f32.mrf.mxu3 }
 0x12d   :  { %v536_v62 = vadd.f32 %v530_v52, %v458_v60  ;;  %v537_v7 = vadd.f32 %v531_v47, %v481_v61 }
 0x12f   :  { %v552_v0 = vsel %vm52_vm0, %v536_v62, -inf  ;;  %v555_v8 = vsel %vm52_vm0, %v537_v7, -inf }
 0x130   :  { %541 = vmax.xlane.f32.xlu0 %v540_v63  ;;  %553 = vmax.xlane.f32.xlu2 %v552_v0 }
 0x134   :  { %v504_v1 = vpop.f32.mrf.mxu2  ;;  %v527_v3 = vpop.f32.mrf.mxu3 }
 0x135   :  { %v538_v2 = vadd.f32 %v530_v52, %v504_v1  ;;  %v539_v4 = vadd.f32 %v531_v47, %v527_v3 }
 0x137   :  { %v558_v5 = vsel %vm52_vm0, %v538_v2, -inf  ;;  %v561_v6 = vsel %vm52_vm0, %v539_v4, -inf }
 0x138   :  { %559 = vmax.xlane.f32.xlu1 %v558_v5  ;;  %562 = vmax.xlane.f32.xlu0 %v561_v6 }
 0x140   :  { %556 = vmax.xlane.f32.xlu1 %v555_v8 }
 0x193   :  { %v545_v10 = vpop.xlane.xlu2 %544 }
 0x194   :  { %v565_v23 = vsub.f32 %v533_v50, %v545_v10 }
 0x196   :  { %v574_v29 = vmul.f32 1.442695, %v565_v23 }
 0x19b   :  { %v548_v11 = vpop.xlane.xlu0 %547  ;;  %v551_v12 = vpop.xlane.xlu1 %550 }
 0x19c   :  { %v566_v13 = vsub.f32 %v534_v55, %v548_v11  ;;  %v567_v14 = vsub.f32 %v535_v56, %v551_v12 }
 0x19e   :  { %v576_v16 = vmul.f32 1.442695, %v566_v13  ;;  %v578_v17 = vmul.f32 1.442695, %v567_v14  ;;  %v813_v13 = vld [vmem:[%s1592_s4 + $0x8] sm:$0xff]  ;;  %v812_v14 = vld [vmem:[%s1592_s4] sm:$0xff] }
 0x1a0   :  { %1219 = vpow2.f32 %v576_v16  ;;  %v815_v16 = vld [vmem:[%s1592_s4 + $0x18] sm:$0xff] }
 0x1a1   :  { %1221 = vpow2.f32 %v578_v17 }
 0x1a3   :  { %v542_v18 = vpop.xlane.xlu0 %541  ;;  %v554_v19 = vpop.xlane.xlu2 %553 }
 0x1a4   :  { %v564_v20 = vsub.f32 %v532_v59, %v542_v18  ;;  %v568_v21 = vsub.f32 %v536_v62, %v554_v19 }
 0x1a6   :  { %v1220_v22 = vpop.eup %1219  ;;  %v572_v24 = vmul.f32 1.442695, %v564_v20  ;;  %v580_v25 = vmul.f32 1.442695, %v568_v21 }
 0x1a7   :  { %v1222_v26 = vpop.eup %1221  ;;  %v594_v27 = vsel %vm52_vm0, %v1220_v22, 0.0 }
 0x1a8   :  { %1223 = vpow2.f32 %v572_v24  ;;  %595 = vadd.xlane.f32.xlu2 %v594_v27  ;;  %v597_v28 = vsel %vm52_vm0, %v1222_v26, 0.0 }
 0x1a9   :  { %1225 = vpow2.f32 %v580_v25  ;;  %598 = vadd.xlane.f32.xlu1 %v597_v28  ;;  %v1460_v28 = vld [vmem:[%s1592_s4 + $0x20] sm:$0xff] }
 0x1aa   :  { %1227 = vpow2.f32 %v574_v29 }
 0x1ab   :  { %v560_v30 = vpop.xlane.xlu1 %559  ;;  %v563_v32 = vpop.xlane.xlu0 %562 }
 0x1ac   :  { %v570_v31 = vsub.f32 %v538_v2, %v560_v30  ;;  %v571_v35 = vsub.f32 %v539_v4, %v563_v32 }
 0x1ae   :  { %v1224_v33 = vpop.eup %1223  ;;  %v584_v34 = vmul.f32 1.442695, %v570_v31  ;;  %v586_v39 = vmul.f32 1.442695, %v571_v35  ;;  %v939_v31 = vperm.slane %v1460_v28, 0  ;;  %v942_v35 = vld [vmem:[%s1593_s2] sm:$0xff] }
 0x1af   :  { %v1226_v36 = vpop.eup %1225  ;;  %v588_v37 = vsel %vm52_vm0, %v1224_v33, 0.0 }
 0x1b0   :  { %1229 = vpow2.f32 %v584_v34  ;;  %v600_v38 = vsel %vm52_vm0, %v1226_v36, 0.0  ;;  %589 = vadd.xlane.f32.xlu0 %v588_v37  ;;  %v1228_v41 = vpop.eup %1227 }
 0x1b1   :  { %601 = vadd.xlane.f32.xlu1 %v600_v38  ;;  %1231 = vpow2.f32 %v586_v39  ;;  %v591_v46 = vsel %vm52_vm0, %v1228_v41, 0.0 }
 0x1b3   :  { %v557_v40 = vpop.xlane.xlu1 %556 }
 0x1b4   :  { %v569_v42 = vsub.f32 %v537_v7, %v557_v40 }
 0x1b6   :  { %v1230_v43 = vpop.eup %1229  ;;  %v582_v44 = vmul.f32 1.442695, %v569_v42 }
 0x1b7   :  { %v606_v45 = vsel %vm52_vm0, %v1230_v43, 0.0  ;;  %v1232_v47 = vpop.eup %1231 }
 0x1b8   :  { %1233 = vpow2.f32 %v582_v44  ;;  %607 = vadd.xlane.f32.xlu2 %v606_v45  ;;  %592 = vadd.xlane.f32.xlu0 %v591_v46  ;;  %v609_v50 = vsel %vm52_vm0, %v1232_v47, 0.0  ;;  %v943_v45 = vld [vmem:[%s1593_s2 + $0x8] sm:$0xff] }
 0x1be   :  { %v1234_v48 = vpop.eup %1233 }
 0x1bf   :  { %v603_v49 = vsel %vm52_vm0, %v1234_v48, 0.0 }
 0x1c0   :  { %604 = vadd.xlane.f32.xlu0 %v603_v49  ;;  %610 = vadd.xlane.f32.xlu2 %v609_v50  ;;  %v1011_v49 = vld [vmem:[%s1594_s5 + $0x78] sm:$0xff]  ;;  %v1010_v50 = vld [vmem:[%s1594_s5 + $0x70] sm:$0xff] }
 0x21b   :  { %v596_v52 = vpop.xlane.xlu2 %595 }
 0x21c   :  { %1235 = vrcp.f32 %v596_v52  ;;  %v599_v53 = vpop.xlane.xlu1 %598  ;;  %v1008_v52 = vld [vmem:[%s1594_s5 + $0x60] sm:$0xff] }
 0x21d   :  { %1237 = vrcp.f32 %v599_v53  ;;  %v1007_v53 = vld [vmem:[%s1594_s5 + $0x58] sm:$0xff] }
 0x222   :  { %v1236_v55 = vpop.eup %1235 }
 0x223   :  { %v1238_v56 = vpop.eup %1237  ;;  %v622_v57 = vmul.f32 %v1236_v55, %v1220_v22  ;;  %v590_v58 = vpop.xlane.xlu0 %589  ;;  %v1005_v55 = vld [vmem:[%s1594_s5 + $0x48] sm:$0xff] }
 0x224   :  { %v623_v59 = vmul.f32 %v1238_v56, %v1222_v26  ;;  %1239 = vrcp.f32 %v590_v58  ;;  %v602_v60 = vpop.xlane.xlu1 %601  ;;  %v1004_v56 = vld [vmem:[%s1594_s5 + $0x40] sm:$0xff]  ;;  %v1002_v58 = vld [vmem:[%s1594_s5 + $0x30] sm:$0xff] }
 0x225   :  { %1187 = vmatmul.msk.f32.vlgmr.msrb.gmra.mxu2 %vm52_vm0, %v622_v57  ;;  %1241 = vrcp.f32 %v602_v60  ;;  %v1003_v57 = vld [vmem:[%s1594_s5 + $0x38] sm:$0xff]  ;;  %v1000_v60 = vld [vmem:[%s1594_s5 + $0x20] sm:$0xff] }
 0x226   :  { %1188 = vmatmul.msk.f32.vlgmr.msrb.gmra.mxu3 %vm52_vm0, %v623_v59  ;;  %896 = vmatpush.msrb.mxu2 %v814_v15  ;;  %v1001_v59 = vld [vmem:[%s1594_s5 + $0x28] sm:$0xff] }
 0x227   :  { %925 = vmatpush.msrb.mxu3 %v815_v16  ;;  %v1214_v15 = vld [vmem:[%s1594_s5 + $0xe8] sm:$0xff] }
 0x22a   :  { %v1240_v61 = vpop.eup %1239 }
 0x22b   :  { %v608_v62 = vpop.xlane.xlu2 %607  ;;  %v593_v63 = vpop.xlane.xlu0 %592  ;;  %v620_v0 = vmul.f32 %v1240_v61, %v1224_v33  ;;  %v999_v61 = vld [vmem:[%s1594_s5 + $0x18] sm:$0xff] }
 0x22c   :  { %1243 = vrcp.f32 %v608_v62  ;;  %v1242_v1 = vpop.eup %1241  ;;  %v998_v62 = vld [vmem:[%s1594_s5 + $0x10] sm:$0xff] }
 0x22d   :  { %1245 = vrcp.f32 %v593_v63  ;;  %1185 = vmatmul.msk.f32.vlgmr.msrb.gmra.mxu0 %vm52_vm0, %v620_v0  ;;  %v624_v4 = vmul.f32 %v1242_v1, %v1226_v36  ;;  %v997_v63 = vld [vmem:[%s1594_s5 + $0x8] sm:$0xff]  ;;  %v996_v0 = vld [vmem:[%s1594_s5] sm:$0xff] }
 0x22e   :  { %838 = vmatpush.msrb.mxu0 %v812_v14 }
 0x232   :  { %v1244_v2 = vpop.eup %1243 }
 0x233   :  { %v1246_v3 = vpop.eup %1245  ;;  %v626_v5 = vmul.f32 %v1244_v2, %v1230_v43  ;;  %v611_v6 = vpop.xlane.xlu2 %610 }
 0x234   :  { %v605_v7 = vpop.xlane.xlu0 %604  ;;  %1247 = vrcp.f32 %v611_v6  ;;  %v621_v8 = vmul.f32 %v1246_v3, %v1228_v41 }
 0x235   :  { %1249 = vrcp.f32 %v605_v7  ;;  %1189 = vmatmul.msk.f32.vlgmr.msra.gmra.mxu0 %vm52_vm0, %v624_v4  ;;  %1191 = vmatmul.msk.f32.vlgmr.msra.gmra.mxu2 %vm52_vm0, %v626_v5 }
 0x236   :  { %1186 = vmatmul.msk.f32.vlgmr.msrb.gmra.mxu1 %vm52_vm0, %v621_v8  ;;  %1013 = vmatpush.msra.mxu0 %v1011_v49 }
 0x237   :  { %867 = vmatpush.msrb.mxu1 %v813_v13 }
 0x238   :  { %1014 = vmatpush.msra.mxu0 %v1010_v50 }
 0x23a   :  { %v1248_v9 = vpop.eup %1247  ;;  %1015 = vmatpush.msra.mxu0 %v1009_v51 }
 0x23b   :  { %v1250_v10 = vpop.eup %1249  ;;  %v627_v11 = vmul.f32 %v1248_v9, %v1232_v47 }
 0x23c   :  { %v625_v12 = vmul.f32 %v1250_v10, %v1234_v48  ;;  %1016 = vmatpush.msra.mxu0 %v1008_v52  ;;  %v1216_v10 = vld [vmem:[%s1594_s5 + $0xf8] sm:$0xff] }
 0x23d   :  { %1192 = vmatmul.msk.f32.vlgmr.msra.gmra.mxu3 %vm52_vm0, %v627_v11  ;;  %v1215_v11 = vld [vmem:[%s1594_s5 + $0xf0] sm:$0xff] }
 0x23e   :  { %1190 = vmatmul.msk.f32.vlgmr.msra.gmra.mxu1 %vm52_vm0, %v625_v12  ;;  %1017 = vmatpush.msra.mxu0 %v1007_v53 }
 0x23f   :  { %1056 = vmatpush.msra.mxu1 %v1216_v10 }
 0x240   :  { %1018 = vmatpush.msra.mxu0 %v1006_v54  ;;  %v1203_v54 = vld [vmem:[%s1594_s5 + $0x90] sm:$0xff] }
 0x241   :  { %1057 = vmatpush.msra.mxu1 %v1215_v11 }
 0x242   :  { %1019 = vmatpush.msra.mxu0 %v1005_v55  ;;  %v1202_v55 = vld [vmem:[%s1594_s5 + $0x88] sm:$0xff] }
 0x243   :  { %1058 = vmatpush.msra.mxu1 %v1214_v15 }
 0x244   :  { %1020 = vmatpush.msra.mxu0 %v1004_v56  ;;  %v1012_v56 = vperm.slane %v1460_v28, 3 }
 0x246   :  { %1021 = vmatpush.msra.mxu0 %v1003_v57 }
 0x248   :  { %1022 = vmatpush.msra.mxu0 %v1002_v58 }
 0x24a   :  { %1023 = vmatpush.msra.mxu0 %v1001_v59 }
 0x24c   :  { %1024 = vmatpush.msra.mxu0 %v1000_v60 }
 0x24e   :  { %1025 = vmatpush.msra.mxu0 %v999_v61 }
 0x250   :  { %1026 = vmatpush.msra.mxu0 %v998_v62 }
 0x252   :  { %1027 = vmatpush.msra.mxu0 %v997_v63  ;;  %v1055_v63 = vperm.slane %v1460_v28, 4 }
 0x254   :  { %1028 = vmatpush.msra.mxu0 %v996_v0 }
 0x2a8   :  { %v694_v17 = vpop.f32.mrf.mxu2 }
 0x2a9   :  { %1195 = vmatmul.msk.f32.vlgmr.msrb.gmra.mxu1 %vm52_vm0, %v694_v17  ;;  %v717_v19 = vpop.f32.mrf.mxu3  ;;  %v1213_v17 = vld [vmem:[%s1594_s5 + $0xe0] sm:$0xff] }
 0x2aa   :  { %v648_v18 = vpop.f32.mrf.mxu0  ;;  %1059 = vmatpush.msra.mxu1 %v1213_v17 }
 0x2ab   :  { %1193 = vmatmul.msk.f32.vlgmr.msrb.gmra.mxu0 %vm52_vm0, %v648_v18 }
 0x2b1   :  { %1196 = vmatmul.msk.f32.gmra.mxu1 %vm52_vm0, %v717_v19 }
 0x2b2   :  { %v740_v20 = vpop.f32.mrf.mxu0 }
 0x2b3   :  { %v671_v21 = vpop.f32.mrf.mxu1  ;;  %1197 = vmatmul.msk.f32.vlgmr.msrb.gmra.mxu2 %vm52_vm0, %v740_v20  ;;  %v1212_v20 = vld [vmem:[%s1594_s5 + $0xd8] sm:$0xff] }
 0x2b4   :  { %1194 = vmatmul.msk.f32.gmra.mxu0 %vm52_vm0, %v671_v21  ;;  %1060 = vmatpush.msra.mxu1 %v1212_v20 }
 0x2b8   :  { %v786_v22 = vpop.f32.mrf.mxu2 }
 0x2b9   :  { %1199 = vmatmul.msk.f32.vlgmr.msrb.gmra.mxu3 %vm52_vm0, %v786_v22  ;;  %v1211_v22 = vld [vmem:[%s1594_s5 + $0xd0] sm:$0xff] }
 0x2ba   :  { %1061 = vmatpush.msra.mxu1 %v1211_v22 }
 0x2bb   :  { %v763_v23 = vpop.f32.mrf.mxu1 }
 0x2bc   :  { %1198 = vmatmul.msk.f32.gmra.mxu2 %vm52_vm0, %v763_v23 }
 0x2c0   :  { %v809_v24 = vpop.f32.mrf.mxu3 }
 0x2c1   :  { %1200 = vmatmul.msk.f32.gmra.mxu3 %vm52_vm0, %v809_v24  ;;  %v1210_v24 = vld [vmem:[%s1594_s5 + $0xc8] sm:$0xff] }
 0x2c2   :  { %1062 = vmatpush.msra.mxu1 %v1210_v24 }
 0x326   :  { %v869_v26 = vpop.f32.mrf.mxu1 }
 0x328   :  { %v840_v25 = vpop.f32.mrf.mxu0 }
 0x329   :  { %v933_v29 = vadd.f32 %v869_v26, %v840_v25  ;;  %v1209_v26 = vld [vmem:[%s1594_s5 + $0xc0] sm:$0xff] }
 0x32a   :  { %1063 = vmatpush.msra.mxu1 %v1209_v26 }
 0x32e   :  { %v872_v37 = vpop.f32.mrf.mxu1 }
 0x331   :  { %v843_v34 = vpop.f32.mrf.mxu0 }
 0x332   :  { %v936_v39 = vadd.f32 %v872_v37, %v843_v34  ;;  %v990_v34 = vperm.slane %v1460_v28, 1 }
 0x336   :  { %v898_v27 = vpop.f32.mrf.mxu2 }
 0x337   :  { %v934_v30 = vadd.f32 %v933_v29, %v898_v27 }
 0x33c   :  { %v927_v32 = vpop.f32.mrf.mxu3 }
 0x33d   :  { %v935_v33 = vadd.f32 %v934_v30, %v927_v32  ;;  %v1208_v30 = vld [vmem:[%s1594_s5 + $0xb8] sm:$0xff] }
 0x33e   :  { %1064 = vmatpush.msra.mxu1 %v1208_v30 }
 0x33f   :  { %v940_v36 = vadd.f32 %v939_v31, %v935_v33  ;;  %v901_v38 = vpop.f32.mrf.mxu2 }
 0x340   :  { %v937_v41 = vadd.f32 %v936_v39, %v901_v38  ;;  %v993_v39 = vperm.slane %v1460_v28, 2 }
 0x341   :  { %v1466_v40 = vadd.f32 %v942_v35, %v940_v36  ;;  %v1207_v35 = vld [vmem:[%s1594_s5 + $0xb0] sm:$0xff] }
 0x342   :  { %1065 = vmatpush.msra.mxu1 %v1207_v35  ;;  %v1128_v35 = vperm.slane %v1460_v28, 6 }
 0x343   :  { %946 = vadd.xlane.f32.xlu1 %v1466_v40  ;;  %v952_v42 = vmul.f32 %v1466_v40, %v1466_v40 }
 0x344   :  { %v930_v43 = vpop.f32.mrf.mxu3 }
 0x345   :  { %v938_v44 = vadd.f32 %v937_v41, %v930_v43  ;;  %954 = vadd.xlane.f32.xlu2 %v952_v42  ;;  %v1206_v41 = vld [vmem:[%s1594_s5 + $0xa8] sm:$0xff]  ;;  %v1205_v43 = vld [vmem:[%s1594_s5 + $0xa0] sm:$0xff] }
 0x346   :  { %1066 = vmatpush.msra.mxu1 %v1206_v41 }
 0x347   :  { %v941_v46 = vadd.f32 %v939_v31, %v938_v44 }
 0x348   :  { %1067 = vmatpush.msra.mxu1 %v1205_v43 }
 0x349   :  { %v1474_v47 = vadd.f32 %v943_v45, %v941_v46  ;;  %v1204_v46 = vld [vmem:[%s1594_s5 + $0x98] sm:$0xff] }
 0x34a   :  { %1068 = vmatpush.msra.mxu1 %v1204_v46 }
 0x34b   :  { %948 = vadd.xlane.f32.xlu0 %v1474_v47  ;;  %v953_v48 = vmul.f32 %v1474_v47, %v1474_v47 }
 0x34c   :  { %1069 = vmatpush.msra.mxu1 %v1203_v54 }
 0x34d   :  { %956 = vadd.xlane.f32.xlu1 %v953_v48 }
 0x34e   :  { %1070 = vmatpush.msra.mxu1 %v1202_v55 }
 0x3b6   :  { %v947_v1 = vpop.xlane.xlu1 %946 }
 0x3b7   :  { %v950_v2 = vmul.f32 0.03125, %v947_v1 }
 0x3b8   :  { %v955_v3 = vpop.xlane.xlu2 %954 }
 0x3b9   :  { %v962_v4 = vmul.f32 %v950_v2, %v950_v2  ;;  %v958_v5 = vmul.f32 0.03125, %v955_v3  ;;  %v960_v33 = vsub.f32 %v1466_v40, %v950_v2 }
 0x3bb   :  { %v964_v6 = vsub.f32 %v958_v5, %v962_v4 }
 0x3bd   :  { %v966_v7 = vadd.f32 1e-05, %v964_v6 }
 0x3be   :  { %v949_v8 = vpop.xlane.xlu0 %948 }
 0x3bf   :  { %1251 = vrsqrt.f32 %v966_v7  ;;  %v951_v9 = vmul.f32 0.03125, %v949_v8  ;;  %vm974_vm2 = vweird.f32 %v966_v7 }
 0x3c0   :  { %v957_v12 = vpop.xlane.xlu1 %956 }
 0x3c1   :  { %v963_v13 = vmul.f32 %v951_v9, %v951_v9  ;;  %v959_v14 = vmul.f32 0.03125, %v957_v12  ;;  %v961_v49 = vsub.f32 %v1474_v47, %v951_v9  ;;  %v1201_v47 = vld [vmem:[%s1594_s5 + $0x80] sm:$0xff] }
 0x3c2   :  { %1071 = vmatpush.msra.mxu1 %v1201_v47 }
 0x3c3   :  { %v965_v16 = vsub.f32 %v959_v14, %v963_v13 }
 0x3c5   :  { %v1252_v18 = vpop.eup %1251  ;;  %v967_v19 = vadd.f32 1e-05, %v965_v16 }
 0x3c6   :  { %v969_v21 = vmul.f32 %v1252_v18, %v966_v7  ;;  %vm975_vm1 = vweird.f32 %v1252_v18 }
 0x3c7   :  { %1253 = vrsqrt.f32 %v967_v19  ;;  %vm976_vm3 = vmor %vm974_vm2, %vm975_vm1  ;;  %vm984_vm5 = vweird.f32 %v967_v19 }
 0x3c8   :  { %v970_v23 = vmul.f32 %v1252_v18, %v969_v21 }
 0x3ca   :  { %v971_v25 = vmul.f32 0.5, %v970_v23 }
 0x3cc   :  { %v972_v27 = vsub.f32 1.5, %v971_v25 }
 0x3cd   :  { %v1254_v29 = vpop.eup %1253 }
 0x3ce   :  { %v973_v31 = vmul.f32 %v1252_v18, %v972_v27  ;;  %v979_v32 = vmul.f32 %v1254_v29, %v967_v19  ;;  %vm985_vm4 = vweird.f32 %v1254_v29 }
 0x3cf   :  { %vm986_vm6 = vmor %vm984_vm5, %vm985_vm4 }
 0x3d0   :  { %v977_v36 = vsel %vm976_vm3, %v1252_v18, %v973_v31  ;;  %v980_v37 = vmul.f32 %v1254_v29, %v979_v32  ;;  %v1125_v32 = vperm.slane %v1460_v28, 5 }
 0x3d1   :  { %v988_v38 = vmul.f32 %v977_v36, %v960_v33 }
 0x3d2   :  { %v981_v42 = vmul.f32 0.5, %v980_v37 }
 0x3d3   :  { %v991_v40 = vmul.f32 %v990_v34, %v988_v38 }
 0x3d4   :  { %v982_v44 = vsub.f32 1.5, %v981_v42 }
 0x3d5   :  { %v994_v45 = vadd.f32 %v993_v39, %v991_v40 }
 0x3d6   :  { %v983_v48 = vmul.f32 %v1254_v29, %v982_v44 }
 0x3d7   :  { %1029 = vmatmul.f32.vlgmr.msra.gmra.mxu0 %v994_v45 }
 0x3d8   :  { %v987_v50 = vsel %vm986_vm6, %v1254_v29, %v983_v48 }
 0x3d9   :  { %v989_v51 = vmul.f32 %v987_v50, %v961_v49 }
 0x3db   :  { %v992_v52 = vmul.f32 %v990_v34, %v989_v51 }
 0x3dd   :  { %v995_v53 = vadd.f32 %v993_v39, %v992_v52 }
 0x3df   :  { %1032 = vmatmul.f32.gmra.mxu0 %v995_v53 }
 0x454   :  { %v1030_v57 = vpop.f32.mrf.mxu0 }
 0x455   :  { %v1031_v58 = vadd.f32 %v1030_v57, %v1012_v56 }
 0x457   :  { %v1036_v59 = vmax.f32 %v1031_v58, 0.0 }
 0x459   :  { %1072 = vmatmul.f32.vlgmr.msra.gmra.mxu1 %v1036_v59 }
 0x45c   :  { %v1033_v60 = vpop.f32.mrf.mxu0 }
 0x45d   :  { %v1034_v61 = vadd.f32 %v1033_v60, %v1012_v56 }
 0x45f   :  { %v1037_v62 = vmax.f32 %v1034_v61, 0.0 }
 0x461   :  { %1075 = vmatmul.f32.gmra.mxu1 %v1037_v62 }
 0x4d6   :  { %v1073_v0 = vpop.f32.mrf.mxu1 }
 0x4d7   :  { %v1074_v1 = vadd.f32 %v1073_v0, %v1055_v63 }
 0x4d9   :  { %v1079_v2 = vadd.f32 %v1074_v1, %v994_v45 }
 0x4db   :  { %1081 = vadd.xlane.f32.xlu2 %v1079_v2  ;;  %v1087_v3 = vmul.f32 %v1079_v2, %v1079_v2 }
 0x4dd   :  { %1089 = vadd.xlane.f32.xlu1 %v1087_v3 }
 0x4de   :  { %v1076_v4 = vpop.f32.mrf.mxu1 }
 0x4df   :  { %v1077_v5 = vadd.f32 %v1076_v4, %v1055_v63 }
 0x4e1   :  { %v1080_v6 = vadd.f32 %v1077_v5, %v995_v53 }
 0x4e3   :  { %1083 = vadd.xlane.f32.xlu0 %v1080_v6  ;;  %v1088_v7 = vmul.f32 %v1080_v6, %v1080_v6 }
 0x4e5   :  { %1091 = vadd.xlane.f32.xlu2 %v1088_v7 }
 0x54e   :  { %v1082_v8 = vpop.xlane.xlu2 %1081 }
 0x54f   :  { %v1085_v9 = vmul.f32 0.03125, %v1082_v8 }
 0x550   :  { %v1090_v10 = vpop.xlane.xlu1 %1089 }
 0x551   :  { %v1097_v11 = vmul.f32 %v1085_v9, %v1085_v9  ;;  %v1093_v12 = vmul.f32 0.03125, %v1090_v10  ;;  %v1095_v31 = vsub.f32 %v1079_v2, %v1085_v9 }
 0x553   :  { %v1099_v13 = vsub.f32 %v1093_v12, %v1097_v11 }
 0x555   :  { %v1101_v14 = vadd.f32 1e-05, %v1099_v13 }
 0x556   :  { %v1084_v15 = vpop.xlane.xlu0 %1083 }
 0x557   :  { %1255 = vrsqrt.f32 %v1101_v14  ;;  %v1086_v16 = vmul.f32 0.03125, %v1084_v15  ;;  %vm1109_vm8 = vweird.f32 %v1101_v14 }
 0x558   :  { %v1092_v17 = vpop.xlane.xlu2 %1091 }
 0x559   :  { %v1098_v18 = vmul.f32 %v1086_v16, %v1086_v16  ;;  %v1094_v19 = vmul.f32 0.03125, %v1092_v17  ;;  %v1096_v40 = vsub.f32 %v1080_v6, %v1086_v16 }
 0x55b   :  { %v1100_v20 = vsub.f32 %v1094_v19, %v1098_v18 }
 0x55d   :  { %v1256_v21 = vpop.eup %1255  ;;  %v1102_v22 = vadd.f32 1e-05, %v1100_v20 }
 0x55e   :  { %v1104_v23 = vmul.f32 %v1256_v21, %v1101_v14  ;;  %vm1110_vm7 = vweird.f32 %v1256_v21 }
 0x55f   :  { %1257 = vrsqrt.f32 %v1102_v22  ;;  %vm1111_vm9 = vmor %vm1109_vm8, %vm1110_vm7  ;;  %vm1119_vm11 = vweird.f32 %v1102_v22 }
 0x560   :  { %v1105_v24 = vmul.f32 %v1256_v21, %v1104_v23 }
 0x562   :  { %v1106_v25 = vmul.f32 0.5, %v1105_v24 }
 0x564   :  { %v1107_v26 = vsub.f32 1.5, %v1106_v25 }
 0x565   :  { %v1258_v27 = vpop.eup %1257 }
 0x566   :  { %v1108_v29 = vmul.f32 %v1256_v21, %v1107_v26  ;;  %v1114_v30 = vmul.f32 %v1258_v27, %v1102_v22  ;;  %vm1120_vm10 = vweird.f32 %v1258_v27 }
 0x567   :  { %vm1121_vm12 = vmor %vm1119_vm11, %vm1120_vm10 }
 0x568   :  { %v1112_v33 = vsel %vm1111_vm9, %v1256_v21, %v1108_v29  ;;  %v1115_v34 = vmul.f32 %v1258_v27, %v1114_v30 }
 0x569   :  { %v1123_v36 = vmul.f32 %v1112_v33, %v1095_v31 }
 0x56a   :  { %v1116_v37 = vmul.f32 0.5, %v1115_v34 }
 0x56b   :  { %v1126_v38 = vmul.f32 %v1125_v32, %v1123_v36 }
 0x56c   :  { %v1117_v39 = vsub.f32 1.5, %v1116_v37 }
 0x56d   :  { %v1129_v41 = vadd.f32 %v1128_v35, %v1126_v38 }
 0x56e   :  { %v1118_v42 = vmul.f32 %v1258_v27, %v1117_v39 }
 0x56f   :  { %1131 = vst [vmem:[%s1595_s6] sm:$0xff] %v1129_v41 }
 0x570   :  { %v1122_v43 = vsel %vm1121_vm12, %v1258_v27, %v1118_v42 }
 0x571   :  { %v1124_v44 = vmul.f32 %v1122_v43, %v1096_v40 }
 0x573   :  { %v1127_v45 = vmul.f32 %v1125_v32, %v1124_v44 }
 0x575   :  { %v1130_v46 = vadd.f32 %v1128_v35, %v1127_v45 }
 0x577   :  { %1132 = vst [vmem:[%s1595_s6 + $0x8] sm:$0xff] %v1130_v46 }

</bundles_post_ra>
